<compile_context>
chip_gen: v6e
topology: v6e:2x2x1
jax: 0.10.0
libtpu: 0.0.40
codegen_flags: <defaults>
</compile_context>

<pallas_src>
import functools

import jax
import jax.numpy as jnp
from jax.experimental import pallas as pl
from jax.experimental.pallas import tpu as pltpu


def mh_attention_kernel(xq_ref, xk_ref, xv_ref, wq_ref, wk_ref, wv_ref,
                        wz_ref, bz_ref, out_ref, attn_ref):
    Lq, D = xq_ref.shape[1], xq_ref.shape[2]
    Lkv = xk_ref.shape[1]
    HD = wq_ref.shape[1]
    H = HD // D

    xq = xq_ref[0]            # (Lq, D)
    xk = xk_ref[0]            # (Lkv, D)
    xv = xv_ref[0]            # (Lkv, D)

    # Lane-dense projections: all heads at once (scale already folded into Wq).
    q = jnp.dot(xq, wq_ref[...], preferred_element_type=jnp.float32)   # (Lq, H*D)
    k = jnp.dot(xk, wk_ref[...], preferred_element_type=jnp.float32)   # (Lkv, H*D)
    v = jnp.dot(xv, wv_ref[...], preferred_element_type=jnp.float32)   # (Lkv, H*D)

    attn_sum = jnp.zeros((Lq, Lkv), jnp.float32)
    z_heads = []
    # H is a small compile-time constant; static slices keep lane offsets static.
    for h in range(H):
        lo = h * D
        qh = q[:, lo:lo + D]                   # (Lq, D)
        kh = k[:, lo:lo + D]                   # (Lkv, D)
        vh = v[:, lo:lo + D]                   # (Lkv, D)

        s = jnp.dot(qh, kh.T, preferred_element_type=jnp.float32)      # (Lq, Lkv)
        m = jnp.max(s, axis=-1, keepdims=True)
        e = jnp.exp(s - m)
        inv_denom = pl.reciprocal(jnp.sum(e, axis=-1, keepdims=True), approx=False)
        attn = e * inv_denom

        attn_sum = attn_sum + attn
        z_heads.append(jnp.dot(attn, vh, preferred_element_type=jnp.float32))

    # Single lane-dense output projection: (Lq, H*D) @ (H*D, D) + bias.
    z_cat = jnp.concatenate(z_heads, axis=-1)                          # (Lq, H*D)
    out = jnp.dot(z_cat, wz_ref[...], preferred_element_type=jnp.float32)
    out = out + bz_ref[...]                                            # (1,D) broadcast

    out_ref[0] = out.astype(out_ref.dtype)
    attn_ref[0] = (attn_sum * (1.0 / H)).astype(attn_ref.dtype)


@jax.jit
def mh_self_attention_wide(xq, xk, xv, wq, wk, wv, wz_weight, bz):
    """xq/xk/xv: (B, L, D). wq/wk/wv: (H, D, D) with Q_h = X @ wq[h].
    wz_weight: (D, H*D) PyTorch nn.Linear weight. bz: (1, D)."""
    B, Lq, D = xq.shape
    Lkv = xk.shape[1]
    H = wq.shape[0]
    HD = H * D

    # Pack per-head weights lane-dense: (D_in, H*D_out), heads major on lanes.
    inv_sqrt_d = 1.0 / (float(D) ** 0.5)     # == (D**-0.25) applied to both Q and K
    wq_cat = (jnp.transpose(wq, (1, 0, 2)).reshape(D, HD) * inv_sqrt_d)
    wk_cat = jnp.transpose(wk, (1, 0, 2)).reshape(D, HD)
    wv_cat = jnp.transpose(wv, (1, 0, 2)).reshape(D, HD)
    wz_t = wz_weight.T                        # (H*D, D): out = z_cat @ Wz.T + b

    out_shape = (
        jax.ShapeDtypeStruct((B, Lq, D), jnp.float32),
        jax.ShapeDtypeStruct((B, Lq, Lkv), jnp.float32),
    )
    in_specs = [
        pl.BlockSpec((1, Lq, D), lambda b: (b, 0, 0)),    # Xq
        pl.BlockSpec((1, Lkv, D), lambda b: (b, 0, 0)),   # Xk
        pl.BlockSpec((1, Lkv, D), lambda b: (b, 0, 0)),   # Xv
        pl.BlockSpec((D, HD), lambda b: (0, 0)),          # Wq packed (scale folded)
        pl.BlockSpec((D, HD), lambda b: (0, 0)),          # Wk packed
        pl.BlockSpec((D, HD), lambda b: (0, 0)),          # Wv packed
        pl.BlockSpec((HD, D), lambda b: (0, 0)),          # Wz.T
        pl.BlockSpec((1, D), lambda b: (0, 0)),           # Wz bias
    ]
    out_specs = [
        pl.BlockSpec((1, Lq, D), lambda b: (b, 0, 0)),    # final projection
        pl.BlockSpec((1, Lq, Lkv), lambda b: (b, 0, 0)),  # mean attention
    ]
    return pl.pallas_call(
        mh_attention_kernel,
        out_shape=out_shape,
        grid_spec=pltpu.PrefetchScalarGridSpec(
            num_scalar_prefetch=0,
            grid=(B,),
            in_specs=in_specs,
            out_specs=out_specs,
        ),
        compiler_params=pltpu.CompilerParams(
            dimension_semantics=("parallel",)),
    )(xq, xk, xv, wq_cat, wk_cat, wv_cat, wz_t, bz)


def reference(xq, xk, xv, wq, wk, wv, wz_weight, bz):
    """Pure-JAX replica of MH_SelfAttentionWide.forward (PyTorch semantics)."""
    D = xq.shape[-1]
    H = wq.shape[0]
    scale = D ** 0.25
    zs = []
    attn_sum = None
    for h in range(H):
        q = (xq @ wq[h]) / scale
        k = (xk @ wk[h]) / scale
        v = xv @ wv[h]
        s = jnp.einsum('bqd,bkd->bqk', q, k)
        attn = jax.nn.softmax(s, axis=-1)
        z = jnp.einsum('bqk,bkd->bqd', attn, v)
        zs.append(z)
        attn_sum = attn if attn_sum is None else attn_sum + attn
    z_cat = jnp.concatenate(zs, axis=-1)              # (B, Lq, H*D)
    out = z_cat @ wz_weight.T + bz[None]              # (B, Lq, D)
    return out, attn_sum / H


if __name__ == "__main__":
    B, Lq, Lkv, D, H = 2, 8, 8, 32, 4

    key = jax.random.PRNGKey(0)
    keys = jax.random.split(key, 8)
    xq = jax.random.normal(keys[0], (B, Lq, D), dtype=jnp.float32)
    xk = jax.random.normal(keys[1], (B, Lkv, D), dtype=jnp.float32)
    xv = jax.random.normal(keys[2], (B, Lkv, D), dtype=jnp.float32)

    # Per-head projection weights, stored already transposed: Q_h = X @ wq[h]
    wq = 0.1 * jax.random.normal(keys[3], (H, D, D), dtype=jnp.float32)
    wk = 0.1 * jax.random.normal(keys[4], (H, D, D), dtype=jnp.float32)
    wv = 0.1 * jax.random.normal(keys[5], (H, D, D), dtype=jnp.float32)

    # Wz: nn.Linear(H*D, D) weight of shape (D, H*D); bias of shape (D,)
    wz_weight = 0.1 * jax.random.normal(keys[6], (D, H * D), dtype=jnp.float32)
    bz = 0.1 * jax.random.normal(keys[7], (1, D), dtype=jnp.float32)

    out, attn_mean = mh_self_attention_wide(xq, xk, xv, wq, wk, wv, wz_weight, bz)
    jax.block_until_ready((out, attn_mean))

    ref_out, ref_attn = reference(xq, xk, xv, wq, wk, wv, wz_weight, bz)

    assert out.shape == (B, Lq, D)
    assert attn_mean.shape == (B, Lq, Lkv)
    assert jnp.allclose(out, ref_out, atol=1e-4, rtol=1e-4), "output mismatch"
    assert jnp.allclose(attn_mean, ref_attn, atol=1e-5, rtol=1e-4), "attn mismatch"

    print("KERNEL_OK")
</pallas_src>

<mosaic_0001>
module attributes {stable_mosaic.version = 11 : i64} {
  func.func @mh_attention_kernel(%arg0: i32, %arg1: memref<1x8x32xf32, #tpu.memory_space<vmem>>, %arg2: memref<1x8x32xf32, #tpu.memory_space<vmem>>, %arg3: memref<1x8x32xf32, #tpu.memory_space<vmem>>, %arg4: memref<32x128xf32, #tpu.memory_space<vmem>>, %arg5: memref<32x128xf32, #tpu.memory_space<vmem>>, %arg6: memref<32x128xf32, #tpu.memory_space<vmem>>, %arg7: memref<128x32xf32, #tpu.memory_space<vmem>>, %arg8: memref<1x32xf32, #tpu.memory_space<vmem>>, %arg9: memref<1x8x32xf32, #tpu.memory_space<vmem>>, %arg10: memref<1x8x8xf32, #tpu.memory_space<vmem>>) attributes {dimension_semantics = [#tpu.dimension_semantics<parallel>], iteration_bounds = array<i64: 2>, scalar_prefetch = 0 : i64, scratch_operands = 0 : i64, tpu.core_type = #tpu.core_type<tc>, window_params = [{transform_indices = @transform_0, window_bounds = array<i64: 1, 8, 32>}, {transform_indices = @transform_1, window_bounds = array<i64: 1, 8, 32>}, {transform_indices = @transform_2, window_bounds = array<i64: 1, 8, 32>}, {pipeline_mode = #tpu.pipeline_mode<synchronous>, transform_indices = @transform_3, window_bounds = array<i64: 32, 128>}, {pipeline_mode = #tpu.pipeline_mode<synchronous>, transform_indices = @transform_4, window_bounds = array<i64: 32, 128>}, {pipeline_mode = #tpu.pipeline_mode<synchronous>, transform_indices = @transform_5, window_bounds = array<i64: 32, 128>}, {pipeline_mode = #tpu.pipeline_mode<synchronous>, transform_indices = @transform_6, window_bounds = array<i64: 128, 32>}, {pipeline_mode = #tpu.pipeline_mode<synchronous>, transform_indices = @transform_7, window_bounds = array<i64: 1, 32>}, {transform_indices = @transform_8, window_bounds = array<i64: 1, 8, 32>}, {transform_indices = @transform_9, window_bounds = array<i64: 1, 8, 8>}]} {
    %c0 = arith.constant 0 : index
    %c0_0 = arith.constant 0 : index
    %c0_1 = arith.constant 0 : index
    %0 = vector.load %arg1[%c0, %c0_0, %c0_1] : memref<1x8x32xf32, #tpu.memory_space<vmem>>, vector<1x8x32xf32>
    %1 = vector.shape_cast %0 : vector<1x8x32xf32> to vector<8x32xf32>
    %c0_2 = arith.constant 0 : index
    %c0_3 = arith.constant 0 : index
    %c0_4 = arith.constant 0 : index
    %2 = vector.load %arg2[%c0_2, %c0_3, %c0_4] : memref<1x8x32xf32, #tpu.memory_space<vmem>>, vector<1x8x32xf32>
    %3 = vector.shape_cast %2 : vector<1x8x32xf32> to vector<8x32xf32>
    %c0_5 = arith.constant 0 : index
    %c0_6 = arith.constant 0 : index
    %c0_7 = arith.constant 0 : index
    %4 = vector.load %arg3[%c0_5, %c0_6, %c0_7] : memref<1x8x32xf32, #tpu.memory_space<vmem>>, vector<1x8x32xf32>
    %5 = vector.shape_cast %4 : vector<1x8x32xf32> to vector<8x32xf32>
    %c0_8 = arith.constant 0 : index
    %c0_9 = arith.constant 0 : index
    %6 = vector.load %arg4[%c0_8, %c0_9] : memref<32x128xf32, #tpu.memory_space<vmem>>, vector<32x128xf32>
    %cst = arith.constant dense<0.000000e+00> : vector<8x128xf32>
    %7 = tpu.matmul %1, %6, %cst {dimension_numbers = #tpu.dot_dimension_numbers<[1], [0], [0], [1], [0, 0, 1, 1], [], []>} : vector<8x32xf32>, vector<32x128xf32>, vector<8x128xf32> -> vector<8x128xf32>
    %c0_10 = arith.constant 0 : index
    %c0_11 = arith.constant 0 : index
    %8 = vector.load %arg5[%c0_10, %c0_11] : memref<32x128xf32, #tpu.memory_space<vmem>>, vector<32x128xf32>
    %cst_12 = arith.constant dense<0.000000e+00> : vector<8x128xf32>
    %9 = tpu.matmul %3, %8, %cst_12 {dimension_numbers = #tpu.dot_dimension_numbers<[1], [0], [0], [1], [0, 0, 1, 1], [], []>} : vector<8x32xf32>, vector<32x128xf32>, vector<8x128xf32> -> vector<8x128xf32>
    %c0_13 = arith.constant 0 : index
    %c0_14 = arith.constant 0 : index
    %10 = vector.load %arg6[%c0_13, %c0_14] : memref<32x128xf32, #tpu.memory_space<vmem>>, vector<32x128xf32>
    %cst_15 = arith.constant dense<0.000000e+00> : vector<8x128xf32>
    %11 = tpu.matmul %5, %10, %cst_15 {dimension_numbers = #tpu.dot_dimension_numbers<[1], [0], [0], [1], [0, 0, 1, 1], [], []>} : vector<8x32xf32>, vector<32x128xf32>, vector<8x128xf32> -> vector<8x128xf32>
    %cst_16 = arith.constant 0.000000e+00 : f32
    %12 = vector.broadcast %cst_16 : f32 to vector<8x8xf32>
    %13 = vector.extract_strided_slice %7 {offsets = [0, 0], sizes = [8, 32], strides = [1, 1]} : vector<8x128xf32> to vector<8x32xf32>
    %14 = vector.extract_strided_slice %9 {offsets = [0, 0], sizes = [8, 32], strides = [1, 1]} : vector<8x128xf32> to vector<8x32xf32>
    %15 = vector.extract_strided_slice %11 {offsets = [0, 0], sizes = [8, 32], strides = [1, 1]} : vector<8x128xf32> to vector<8x32xf32>
    %16 = tpu.transpose %14, [1, 0] : vector<8x32xf32> -> vector<32x8xf32>
    %cst_17 = arith.constant dense<0.000000e+00> : vector<8x8xf32>
    %17 = tpu.matmul %13, %16, %cst_17 {dimension_numbers = #tpu.dot_dimension_numbers<[1], [0], [0], [1], [0, 0, 1, 1], [], []>} : vector<8x32xf32>, vector<32x8xf32>, vector<8x8xf32> -> vector<8x8xf32>
    %cst_18 = arith.constant dense<0xFF800000> : vector<8xf32>
    %18 = vector.multi_reduction <maximumf>, %17, %cst_18 [1] : vector<8x8xf32> to vector<8xf32>
    %19 = vector.shape_cast %18 : vector<8xf32> to vector<8x1xf32>
    %20 = vector.broadcast %19 : vector<8x1xf32> to vector<8x8xf32>
    %21 = arith.subf %17, %20 : vector<8x8xf32>
    %22 = math.exp %21 : vector<8x8xf32>
    %cst_19 = arith.constant dense<0.000000e+00> : vector<8xf32>
    %23 = vector.multi_reduction <add>, %22, %cst_19 [1] : vector<8x8xf32> to vector<8xf32>
    %24 = vector.shape_cast %23 : vector<8xf32> to vector<8x1xf32>
    %25 = tpu.reciprocal %24 : vector<8x1xf32> -> vector<8x1xf32>
    %26 = vector.broadcast %25 : vector<8x1xf32> to vector<8x8xf32>
    %27 = arith.mulf %22, %26 : vector<8x8xf32>
    %28 = arith.addf %12, %27 : vector<8x8xf32>
    %cst_20 = arith.constant dense<0.000000e+00> : vector<8x32xf32>
    %29 = tpu.matmul %27, %15, %cst_20 {dimension_numbers = #tpu.dot_dimension_numbers<[1], [0], [0], [1], [0, 0, 1, 1], [], []>} : vector<8x8xf32>, vector<8x32xf32>, vector<8x32xf32> -> vector<8x32xf32>
    %30 = vector.extract_strided_slice %7 {offsets = [0, 32], sizes = [8, 32], strides = [1, 1]} : vector<8x128xf32> to vector<8x32xf32>
    %31 = vector.extract_strided_slice %9 {offsets = [0, 32], sizes = [8, 32], strides = [1, 1]} : vector<8x128xf32> to vector<8x32xf32>
    %32 = vector.extract_strided_slice %11 {offsets = [0, 32], sizes = [8, 32], strides = [1, 1]} : vector<8x128xf32> to vector<8x32xf32>
    %33 = tpu.transpose %31, [1, 0] : vector<8x32xf32> -> vector<32x8xf32>
    %cst_21 = arith.constant dense<0.000000e+00> : vector<8x8xf32>
    %34 = tpu.matmul %30, %33, %cst_21 {dimension_numbers = #tpu.dot_dimension_numbers<[1], [0], [0], [1], [0, 0, 1, 1], [], []>} : vector<8x32xf32>, vector<32x8xf32>, vector<8x8xf32> -> vector<8x8xf32>
    %cst_22 = arith.constant dense<0xFF800000> : vector<8xf32>
    %35 = vector.multi_reduction <maximumf>, %34, %cst_22 [1] : vector<8x8xf32> to vector<8xf32>
    %36 = vector.shape_cast %35 : vector<8xf32> to vector<8x1xf32>
    %37 = vector.broadcast %36 : vector<8x1xf32> to vector<8x8xf32>
    %38 = arith.subf %34, %37 : vector<8x8xf32>
    %39 = math.exp %38 : vector<8x8xf32>
    %cst_23 = arith.constant dense<0.000000e+00> : vector<8xf32>
    %40 = vector.multi_reduction <add>, %39, %cst_23 [1] : vector<8x8xf32> to vector<8xf32>
    %41 = vector.shape_cast %40 : vector<8xf32> to vector<8x1xf32>
    %42 = tpu.reciprocal %41 : vector<8x1xf32> -> vector<8x1xf32>
    %43 = vector.broadcast %42 : vector<8x1xf32> to vector<8x8xf32>
    %44 = arith.mulf %39, %43 : vector<8x8xf32>
    %45 = arith.addf %28, %44 : vector<8x8xf32>
    %cst_24 = arith.constant dense<0.000000e+00> : vector<8x32xf32>
    %46 = tpu.matmul %44, %32, %cst_24 {dimension_numbers = #tpu.dot_dimension_numbers<[1], [0], [0], [1], [0, 0, 1, 1], [], []>} : vector<8x8xf32>, vector<8x32xf32>, vector<8x32xf32> -> vector<8x32xf32>
    %47 = vector.extract_strided_slice %7 {offsets = [0, 64], sizes = [8, 32], strides = [1, 1]} : vector<8x128xf32> to vector<8x32xf32>
    %48 = vector.extract_strided_slice %9 {offsets = [0, 64], sizes = [8, 32], strides = [1, 1]} : vector<8x128xf32> to vector<8x32xf32>
    %49 = vector.extract_strided_slice %11 {offsets = [0, 64], sizes = [8, 32], strides = [1, 1]} : vector<8x128xf32> to vector<8x32xf32>
    %50 = tpu.transpose %48, [1, 0] : vector<8x32xf32> -> vector<32x8xf32>
    %cst_25 = arith.constant dense<0.000000e+00> : vector<8x8xf32>
    %51 = tpu.matmul %47, %50, %cst_25 {dimension_numbers = #tpu.dot_dimension_numbers<[1], [0], [0], [1], [0, 0, 1, 1], [], []>} : vector<8x32xf32>, vector<32x8xf32>, vector<8x8xf32> -> vector<8x8xf32>
    %cst_26 = arith.constant dense<0xFF800000> : vector<8xf32>
    %52 = vector.multi_reduction <maximumf>, %51, %cst_26 [1] : vector<8x8xf32> to vector<8xf32>
    %53 = vector.shape_cast %52 : vector<8xf32> to vector<8x1xf32>
    %54 = vector.broadcast %53 : vector<8x1xf32> to vector<8x8xf32>
    %55 = arith.subf %51, %54 : vector<8x8xf32>
    %56 = math.exp %55 : vector<8x8xf32>
    %cst_27 = arith.constant dense<0.000000e+00> : vector<8xf32>
    %57 = vector.multi_reduction <add>, %56, %cst_27 [1] : vector<8x8xf32> to vector<8xf32>
    %58 = vector.shape_cast %57 : vector<8xf32> to vector<8x1xf32>
    %59 = tpu.reciprocal %58 : vector<8x1xf32> -> vector<8x1xf32>
    %60 = vector.broadcast %59 : vector<8x1xf32> to vector<8x8xf32>
    %61 = arith.mulf %56, %60 : vector<8x8xf32>
    %62 = arith.addf %45, %61 : vector<8x8xf32>
    %cst_28 = arith.constant dense<0.000000e+00> : vector<8x32xf32>
    %63 = tpu.matmul %61, %49, %cst_28 {dimension_numbers = #tpu.dot_dimension_numbers<[1], [0], [0], [1], [0, 0, 1, 1], [], []>} : vector<8x8xf32>, vector<8x32xf32>, vector<8x32xf32> -> vector<8x32xf32>
    %64 = vector.extract_strided_slice %7 {offsets = [0, 96], sizes = [8, 32], strides = [1, 1]} : vector<8x128xf32> to vector<8x32xf32>
    %65 = vector.extract_strided_slice %9 {offsets = [0, 96], sizes = [8, 32], strides = [1, 1]} : vector<8x128xf32> to vector<8x32xf32>
    %66 = vector.extract_strided_slice %11 {offsets = [0, 96], sizes = [8, 32], strides = [1, 1]} : vector<8x128xf32> to vector<8x32xf32>
    %67 = tpu.transpose %65, [1, 0] : vector<8x32xf32> -> vector<32x8xf32>
    %cst_29 = arith.constant dense<0.000000e+00> : vector<8x8xf32>
    %68 = tpu.matmul %64, %67, %cst_29 {dimension_numbers = #tpu.dot_dimension_numbers<[1], [0], [0], [1], [0, 0, 1, 1], [], []>} : vector<8x32xf32>, vector<32x8xf32>, vector<8x8xf32> -> vector<8x8xf32>
    %cst_30 = arith.constant dense<0xFF800000> : vector<8xf32>
    %69 = vector.multi_reduction <maximumf>, %68, %cst_30 [1] : vector<8x8xf32> to vector<8xf32>
    %70 = vector.shape_cast %69 : vector<8xf32> to vector<8x1xf32>
    %71 = vector.broadcast %70 : vector<8x1xf32> to vector<8x8xf32>
    %72 = arith.subf %68, %71 : vector<8x8xf32>
    %73 = math.exp %72 : vector<8x8xf32>
    %cst_31 = arith.constant dense<0.000000e+00> : vector<8xf32>
    %74 = vector.multi_reduction <add>, %73, %cst_31 [1] : vector<8x8xf32> to vector<8xf32>
    %75 = vector.shape_cast %74 : vector<8xf32> to vector<8x1xf32>
    %76 = tpu.reciprocal %75 : vector<8x1xf32> -> vector<8x1xf32>
    %77 = vector.broadcast %76 : vector<8x1xf32> to vector<8x8xf32>
    %78 = arith.mulf %73, %77 : vector<8x8xf32>
    %79 = arith.addf %62, %78 : vector<8x8xf32>
    %cst_32 = arith.constant dense<0.000000e+00> : vector<8x32xf32>
    %80 = tpu.matmul %78, %66, %cst_32 {dimension_numbers = #tpu.dot_dimension_numbers<[1], [0], [0], [1], [0, 0, 1, 1], [], []>} : vector<8x8xf32>, vector<8x32xf32>, vector<8x32xf32> -> vector<8x32xf32>
    %81 = tpu.concatenate %29, %46, %63, %80 in 1 : vector<8x32xf32>, vector<8x32xf32>, vector<8x32xf32>, vector<8x32xf32> -> vector<8x128xf32>
    %c0_33 = arith.constant 0 : index
    %c0_34 = arith.constant 0 : index
    %82 = vector.load %arg7[%c0_33, %c0_34] : memref<128x32xf32, #tpu.memory_space<vmem>>, vector<128x32xf32>
    %cst_35 = arith.constant dense<0.000000e+00> : vector<8x32xf32>
    %83 = tpu.matmul %81, %82, %cst_35 {dimension_numbers = #tpu.dot_dimension_numbers<[1], [0], [0], [1], [0, 0, 1, 1], [], []>} : vector<8x128xf32>, vector<128x32xf32>, vector<8x32xf32> -> vector<8x32xf32>
    %c0_36 = arith.constant 0 : index
    %c0_37 = arith.constant 0 : index
    %84 = vector.load %arg8[%c0_36, %c0_37] : memref<1x32xf32, #tpu.memory_space<vmem>>, vector<1x32xf32>
    %85 = vector.broadcast %84 : vector<1x32xf32> to vector<8x32xf32>
    %86 = arith.addf %83, %85 : vector<8x32xf32>
    %c0_38 = arith.constant 0 : index
    %c0_39 = arith.constant 0 : index
    %c0_40 = arith.constant 0 : index
    %87 = vector.load %arg9[%c0_38, %c0_39, %c0_40] : memref<1x8x32xf32, #tpu.memory_space<vmem>>, vector<1x8x32xf32>
    %88 = vector.shape_cast %87 : vector<1x8x32xf32> to vector<8x32xf32>
    %89 = vector.shape_cast %86 : vector<8x32xf32> to vector<1x8x32xf32>
    tpu.vector_store %arg9[%c0_38, %c0_39, %c0_40], %89 {strides = array<i32>} : memref<1x8x32xf32, #tpu.memory_space<vmem>>, vector<1x8x32xf32>,
    %cst_41 = arith.constant 2.500000e-01 : f32
    %90 = vector.broadcast %cst_41 : f32 to vector<8x8xf32>
    %91 = arith.mulf %79, %90 : vector<8x8xf32>
    %c0_42 = arith.constant 0 : index
    %c0_43 = arith.constant 0 : index
    %c0_44 = arith.constant 0 : index
    %92 = vector.load %arg10[%c0_42, %c0_43, %c0_44] : memref<1x8x8xf32, #tpu.memory_space<vmem>>, vector<1x8x8xf32>
    %93 = vector.shape_cast %92 : vector<1x8x8xf32> to vector<8x8xf32>
    %94 = vector.shape_cast %91 : vector<8x8xf32> to vector<1x8x8xf32>
    tpu.vector_store %arg10[%c0_42, %c0_43, %c0_44], %94 {strides = array<i32>} : memref<1x8x8xf32, #tpu.memory_space<vmem>>, vector<1x8x8xf32>,
    return
  }
  func.func @transform_0(%arg0: i32) -> (i32, i32, i32) {
    %c0_i32 = arith.constant 0 : i32
    %c0_i32_0 = arith.constant 0 : i32
    %c0_i32_1 = arith.constant 0 : i32
    return %arg0, %c0_i32, %c0_i32_0 : i32, i32, i32
  }
  func.func @transform_1(%arg0: i32) -> (i32, i32, i32) {
    %c0_i32 = arith.constant 0 : i32
    %c0_i32_0 = arith.constant 0 : i32
    %c0_i32_1 = arith.constant 0 : i32
    return %arg0, %c0_i32, %c0_i32_0 : i32, i32, i32
  }
  func.func @transform_2(%arg0: i32) -> (i32, i32, i32) {
    %c0_i32 = arith.constant 0 : i32
    %c0_i32_0 = arith.constant 0 : i32
    %c0_i32_1 = arith.constant 0 : i32
    return %arg0, %c0_i32, %c0_i32_0 : i32, i32, i32
  }
  func.func @transform_3(%arg0: i32) -> (i32, i32) {
    %c0_i32 = arith.constant 0 : i32
    %c0_i32_0 = arith.constant 0 : i32
    %c0_i32_1 = arith.constant 0 : i32
    return %c0_i32, %c0_i32_0 : i32, i32
  }
  func.func @transform_4(%arg0: i32) -> (i32, i32) {
    %c0_i32 = arith.constant 0 : i32
    %c0_i32_0 = arith.constant 0 : i32
    %c0_i32_1 = arith.constant 0 : i32
    return %c0_i32, %c0_i32_0 : i32, i32
  }
  func.func @transform_5(%arg0: i32) -> (i32, i32) {
    %c0_i32 = arith.constant 0 : i32
    %c0_i32_0 = arith.constant 0 : i32
    %c0_i32_1 = arith.constant 0 : i32
    return %c0_i32, %c0_i32_0 : i32, i32
  }
  func.func @transform_6(%arg0: i32) -> (i32, i32) {
    %c0_i32 = arith.constant 0 : i32
    %c0_i32_0 = arith.constant 0 : i32
    %c0_i32_1 = arith.constant 0 : i32
    return %c0_i32, %c0_i32_0 : i32, i32
  }
  func.func @transform_7(%arg0: i32) -> (i32, i32) {
    %c0_i32 = arith.constant 0 : i32
    %c0_i32_0 = arith.constant 0 : i32
    %c0_i32_1 = arith.constant 0 : i32
    return %c0_i32, %c0_i32_0 : i32, i32
  }
  func.func @transform_8(%arg0: i32) -> (i32, i32, i32) {
    %c0_i32 = arith.constant 0 : i32
    %c0_i32_0 = arith.constant 0 : i32
    %c0_i32_1 = arith.constant 0 : i32
    return %arg0, %c0_i32, %c0_i32_0 : i32, i32, i32
  }
  func.func @transform_9(%arg0: i32) -> (i32, i32, i32) {
    %c0_i32 = arith.constant 0 : i32
    %c0_i32_0 = arith.constant 0 : i32
    %c0_i32_1 = arith.constant 0 : i32
    return %arg0, %c0_i32, %c0_i32_0 : i32, i32, i32
  }
}

</mosaic_0001>

<bundles_post_ra>
// kernel: mh_self_attention_wide.1
= control target key start
LH: loop header
LB: loop body
LE: loop exit
PB: predicated region body
PF: predicated region fallthrough
CT: control target
= control target key end

     0   :  { %s2257_s0 = inlined_call_operand.vmem [shape: f32[2,8,32], index: 0, kind: input, shape index: {}]   ;;  %s2258_s1 = inlined_call_operand.vmem [shape: f32[2,8,32], index: 1, kind: input, shape index: {}]   ;;  %s2259_s2 = inlined_call_operand.vmem [shape: f32[2,8,32], index: 2, kind: input, shape index: {}]   ;;  %s2260_s3 = inlined_call_operand.vmem [shape: f32[32,128], index: 3, kind: input, shape index: {}]   ;;  %s2261_s4 = inlined_call_operand.vmem [shape: f32[32,128], index: 4, kind: input, shape index: {}]   ;;  %s2262_s5 = inlined_call_operand.vmem [shape: f32[32,128], index: 5, kind: input, shape index: {}]   ;;  %s2263_s6 = inlined_call_operand.vmem [shape: f32[128,32], index: 6, kind: input, shape index: {}]   ;;  %s2264_s7 = inlined_call_operand.vmem [shape: f32[1,32], index: 7, kind: input, shape index: {}]   ;;  %s2265_s8 = inlined_call_operand.hbm [shape: f32[2,8,32], index: 8, kind: output, shape index: {0}]   ;;  %s2266_s9 = inlined_call_operand.hbm [shape: f32[2,8,8], index: 9, kind: output, shape index: {1}]  }
   0x1   :  { %2270 = sst [smem:[#allocation8_spill]] %s2257_s0 }
   0x2   :  { %2271 = sst [smem:[#allocation9_spill]] %s2258_s1 }
   0x3   :  { %15 = vsyncpa [#allocation3], 0 }
   0x4   :  { %17 = vsyncpa [#allocation3 + $0x1], 0 }
   0x5   :  { %18 = vsyncpa [#allocation5], 0 }
   0x6   :  { %20 = vsyncpa [#allocation5 + $0x1], 0  ;;  %s1930_s30 = smov 0   ;;  %s1932_s10 = smov 0  }
   0x7   :  { %s1934_s11 = smov 0   ;;  %s1936_s12 = smov 0  }
   0x8 LB: > { %s1951_s13 = sadd.s32 4294967295, %s1871_s12   ;;  %s1529_s14 = sadd.s32 4294967294, %s1871_s12   ;;  %s1871_s12 = sphi %s1936_s12, %s2282_s12   ;;  %s1867_s11 = sphi %s1934_s11, %s2281_s11   ;;  %s1863_s10 = sphi %s1932_s10, %s2280_s10   ;;  %s1859_s30 = sphi %s1930_s30, %s2279_s30  }
   0x9   : > { %s1955_s15 = sadd.s32 1, %s1871_s12   ;;  %s216_s16 = sadd.s32 1, %s1867_s11 }
   0xa   : > { %s213_s17 = ssub.s32 %s1871_s12, %s1955_s15  ;;  %p226_p0 = scmp.ne.s32.totalorder %s1867_s11, %s1863_s10 }
   0xb   : > { %p214_p1 = scmp.eq.s32.totalorder %s213_s17, 0  ;;  %p227_p2 = scmp.eq.s32.totalorder %s1951_s13, 1 }
   0xc   : > { %p232_p3 = scmp.ne.s32.totalorder %s1863_s10, %s1859_s30  ;;  %p233_p4 = scmp.eq.s32.totalorder %s1529_s14, 1 }
   0xd   : > { %s1966_s18 = scalar_select %p214_p1, %s1867_s11, %s216_s16  }
   0xe   : > { %p1968_p5 = por %p227_p2, %p226_p0  ;;  %p1972_p6 = por %p233_p4, %p232_p3 }
   0xf   : > { %p1532_p7 = scmp.ge.s32.totalorder %s1871_s12, 1  ;;  %p313_p8 = scmp.lt.s32.totalorder %s1871_s12, 3 }
  0x11   : > { %p314_p9 = pnand %p1532_p7, %p313_p8 }
  0x12   : > { %p361_p10 = scmp.lt.s32.totalorder (!%p314_p9), %s1951_s13, 1  ;;  %s2274_s0 = sld [smem:[#allocation8_spill]] (!%p314_p9) }
  0x13   : > { %317 = sbr.rel (%p314_p9) target bundleno = 1384 (0x568), region = 52  ;;  %s2275_s1 = sld [smem:[#allocation9_spill]] (!%p314_p9) }
  0x14   : > { %s1875_s22 = smov (!%p314_p9), 64   ;;  %s2268_s23 = smov (!%p314_p9), 96  }
  0x15   : > { %s2110_s24 = sand.u32 (!%p314_p9), 1, %s1863_s10   ;;  %s2276_s27 = smov (!%p314_p9), 96  }
  0x16   : > { %s1388_s17 = scalar_lea.sflag (!%p314_p9), [#allocation5], %s2110_s24 }
  0x18   : > { %v379_v0 = vld [vmem:[%s2260_s3 + $0x18] sm:$0xff]  ;;  %v1873_v1 = vmov 0.0   ;;  %v378_v2 = vld [vmem:[%s2260_s3 + $0x10] sm:$0xff]  ;;  %vm1874_vm0 = vmmov 0   ;;  %s362_s25 = scalar_select %p361_p10, %s1951_s13, 1  ;;  %v377_v3 = vld [vmem:[%s2260_s3 + $0x8] sm:$0xff] }
  0x19   : > { %1608 = vmatprep.subr.mxu1 %v1873_v1  ;;  %1616 = vmatprep.mubr.msk.f32.mxu1 %vm1874_vm0, %v1873_v1  ;;  %v376_v4 = vld [vmem:[%s2260_s3] sm:$0xff]  ;;  %vm380_vm1 = vcmask 261120   ;;  %v457_v6 = vld [vmem:[%s2261_s4 + $0x18] sm:$0xff]  ;;  %v456_v7 = vld [vmem:[%s2261_s4 + $0x10] sm:$0xff]  ;;  %vm684_vm2 = vcmask 64512   ;;  %vm1282_vm3 = vcmask 523264  }
  0x1a   : > { %1609 = vmatpush3.msra.mxu1 %v379_v0  ;;  %1651 = vmatprep.subr.mxu0 %v1873_v1  ;;  %s1996_s28 = sshll.u32 %s362_s25, 3  ;;  %v455_v8 = vld [vmem:[%s2261_s4 + $0x8] sm:$0xff]  ;;  %v454_v9 = vld [vmem:[%s2261_s4] sm:$0xff]  ;;  %v534_v11 = vld [vmem:[%s2262_s5 + $0x18] sm:$0xff]  ;;  %s2267_s25 = sshll.u32 %s2110_s24, 3  ;;  %vm1284_vm4 = vcmask 785408  }
  0x1b   : > { %1610 = vmatprep.subr.mxu1 %v1873_v1  ;;  %1653 = vmatprep.mubr.msk.f32.mxu0 %vm1874_vm0, %v1873_v1  ;;  %s364_s21 = scalar_lea.vmem %s2274_s0, %s1996_s28  ;;  %s368_s16 = scalar_lea.vmem %s2275_s1, %s1996_s28  ;;  %v533_v12 = vld [vmem:[%s2262_s5 + $0x10] sm:$0xff]  ;;  %v532_v13 = vld [vmem:[%s2262_s5 + $0x8] sm:$0xff]  ;;  %v531_v14 = vld [vmem:[%s2262_s5] sm:$0xff] }
  0x1c   : > { %1611 = vmatpush3.msra.mxu1 %v378_v2  ;;  %v373_v5 = vld [vmem:[%s364_s21] sm:$0xff]  ;;  %s372_s21 = scalar_lea.vmem %s2259_s2, %s1996_s28  ;;  %s1877_s28 = smov 32  }
  0x1d   : > { %1612 = vmatprep.subr.mxu1 %v1873_v1  ;;  %v374_v10 = vld [vmem:[%s368_s16] sm:$0xff]  ;;  %s2119_s26 = scalar_lea.vmem [#allocation4], %s2267_s25  ;;  %s1878_s25 = smov [#allocation4]  }
  0x1e   : > { %1613 = vmatpush3.msra.mxu1 %v377_v3  ;;  %v375_v15 = vld [vmem:[%s372_s21] sm:$0xff]  ;;  %s1414_s16 = sshll.u32 %s2119_s26, 4  ;;  %s1785_s21 = sshll.u32 %s1878_s25, 4  ;;  %s1415_s16 = int_to_ptr.vmem [resolvable:$true] %s1414_s16  ;;  %s1786_s21 = int_to_ptr.vmem [resolvable:$false] %s1785_s21 }
  0x1f   : > { %1614 = vmatprep.subr.mxu1 %v1873_v1  ;;  %p1788_p0 = scmp.lt.s32.totalorder %s1415_s16, %s1786_s21 }
  0x20   : > { %1615 = vmatpush3.msra.mxu1 %v376_v4 }
  0x21   : > { %1617 = vmatmul.mubr.msk.f32.vlgmr.msra.gmra.mxu1 %vm380_vm1, %v373_v5  ;;  %1619 = vmatprep.subr.mxu1 %v1873_v1 }
  0x22   : > { %1620 = vmatpush3.msra.mxu1 %v457_v6  ;;  %1627 = vmatprep.mubr.msk.f32.mxu1 %vm1874_vm0, %v1873_v1 }
  0x23   : > { %1621 = vmatprep.subr.mxu1 %v1873_v1 }
  0x24   : > { %1622 = vmatpush3.msra.mxu1 %v456_v7 }
  0x25   : > { %1623 = vmatprep.subr.mxu1 %v1873_v1 }
  0x26   : > { %1624 = vmatpush3.msra.mxu1 %v455_v8 }
  0x27   : > { %1625 = vmatprep.subr.mxu1 %v1873_v1 }
  0x28   : > { %1626 = vmatpush3.msra.mxu1 %v454_v9 }
  0x29   : > { %1628 = vmatmul.mubr.msk.f32.vlgmr.msra.gmra.mxu1 %vm380_vm1, %v374_v10  ;;  %1630 = vmatprep.subr.mxu1 %v1873_v1 }
  0x2a   : > { %1638 = vmatprep.mubr.msk.f32.mxu1 %vm1874_vm0, %v1873_v1  ;;  %1631 = vmatpush3.msra.mxu1 %v534_v11 }
  0x2b   : > { %1632 = vmatprep.subr.mxu1 %v1873_v1 }
  0x2c   : > { %1633 = vmatpush3.msra.mxu1 %v533_v12 }
  0x2d   : > { %1634 = vmatprep.subr.mxu1 %v1873_v1 }
  0x2e   : > { %1635 = vmatpush3.msra.mxu1 %v532_v13 }
  0x2f   : > { %1636 = vmatprep.subr.mxu1 %v1873_v1 }
  0x30   : > { %1637 = vmatpush3.msra.mxu1 %v531_v14 }
  0x31   : > { %1639 = vmatmul.mubr.msk.f32.vlgmr.msra.gmra.mxu1 %vm380_vm1, %v375_v15  ;;  %1641 = vmatprep.subr.mxu1 %v1873_v1 }
  0x32   : > { %1643 = vmatprep.mubr.msk.f32.mxu1 %vm1874_vm0, %v1873_v1 }
  0xe1   : > { %v450_v16 = vpop.f32.mrf.mxu1 }
  0xe3   : > { %v1618_v17 = vpop.f32.mrf.mxu1 }
  0xe4   : > { %v1300_v17 = vld [vmem:[%s2263_s6 + $0x70] sm:$0xff] }
  0xe9   : > { %v527_v18 = vpop.f32.mrf.mxu1 }
  0xea   : > { %939 = vrot.lane.b32.xlu1 %v527_v18, %s1875_s22  ;;  %772 = vrot.lane.b32.xlu0 %v527_v18, %s2268_s23 }
  0xeb   : > { %1642 = vmatpush3.xpose.msk.msra.mxu1 %vm380_vm1, %v527_v18  ;;  %v1629_v19 = vpop.f32.mrf.mxu1 }
  0xec   : > { %1646 = vmatprep.subr.mxu1 %v1873_v1  ;;  %v1298_v19 = vld [vmem:[%s2263_s6 + $0x60] sm:$0xff] }
  0xee   : > { %1644 = vmatmul.mubr.msk.f32.vlgmr.msra.gmra.mxu1 %vm380_vm1, %v450_v16  ;;  %937 = vrot.lane.b32.xlu1 %v450_v16, %s1875_s22 }
  0xef   : > { %770 = vrot.lane.b32.xlu0 %v450_v16, %s2268_s23  ;;  %1648 = vmatprep.mubr.msk.f32.mxu1 %vm1874_vm0, %v1873_v1 }
  0xf1   : > { %v2068_v20 = vpop.f32.mrf.mxu1 }
  0xf2   : > { %1103 = vrot.lane.b32.xlu1 %v450_v16, %s1877_s28  ;;  %1647 = vmatpush3.msra.mxu1 %v2068_v20  ;;  %v1301_v16 = vld [vmem:[%s2263_s6 + $0x78] sm:$0xff] }
  0xf3   : > { %1105 = vrot.lane.b32.xlu0 %v527_v18, %s1877_s28  ;;  %v1640_v21 = vpop.f32.mrf.mxu1  ;;  %1656 = vmatprep.subr.mxu1 %v1873_v1  ;;  %v1299_v18 = vld [vmem:[%s2263_s6 + $0x68] sm:$0xff] }
  0xf4   : > { %v1296_v21 = vld [vmem:[%s2263_s6 + $0x50] sm:$0xff] }
 0x15c   : > { %v773_v22 = vpop.permute.xlu0 %772  ;;  %v940_v23 = vpop.permute.xlu1 %939 }
 0x15d   : > { %1652 = vmatpush3.xpose.msk.msra.mxu0 %vm380_vm1, %v773_v22  ;;  %v1295_v22 = vld [vmem:[%s2263_s6 + $0x48] sm:$0xff] }
 0x15e   : > { %1661 = vmatprep.subr.mxu0 %v1873_v1 }
 0x160   : > { %v938_v25 = vpop.permute.xlu1 %937 }
 0x161   : > { %v771_v24 = vpop.permute.xlu0 %770 }
 0x162   : > { %1654 = vmatmul.mubr.msk.f32.vlgmr.msra.gmra.mxu0 %vm380_vm1, %v771_v24 }
 0x163   : > { %1662 = vmatpush3.xpose.msk.msra.mxu0 %vm380_vm1, %v940_v23  ;;  %1663 = vmatprep.mubr.msk.f32.mxu0 %vm1874_vm0, %v1873_v1  ;;  %v1294_v23 = vld [vmem:[%s2263_s6 + $0x40] sm:$0xff] }
 0x164   : > { %1671 = vmatprep.subr.mxu0 %v1873_v1  ;;  %v1104_v27 = vpop.permute.xlu1 %1103 }
 0x165   : > { %v1106_v26 = vpop.permute.xlu0 %1105 }
 0x166   : > { %1664 = vmatmul.mubr.msk.f32.vlgmr.msra.gmra.mxu0 %vm380_vm1, %v938_v25  ;;  %v1293_v25 = vld [vmem:[%s2263_s6 + $0x38] sm:$0xff] }
 0x167   : > { %1672 = vmatpush3.xpose.msk.msra.mxu0 %vm380_vm1, %v1106_v26  ;;  %1673 = vmatprep.mubr.msk.f32.mxu0 %vm1874_vm0, %v1873_v1 }
 0x168   : > { %1681 = vmatprep.subr.mxu0 %v1873_v1 }
 0x16a   : > { %1674 = vmatmul.mubr.msk.f32.vlgmr.msra.gmra.mxu0 %vm380_vm1, %v1104_v27  ;;  %v1292_v27 = vld [vmem:[%s2263_s6 + $0x30] sm:$0xff] }
 0x16b   : > { %1713 = vmatprep.mubr.msk.f32.mxu0 %vm1874_vm0, %v1873_v1  ;;  %1682 = vmatpush3.msra.mxu0 %v1301_v16 }
 0x16c   : > { %1683 = vmatprep.subr.mxu0 %v1873_v1 }
 0x16d   : > { %1684 = vmatpush3.msra.mxu0 %v1300_v17 }
 0x16e   : > { %1685 = vmatprep.subr.mxu0 %v1873_v1 }
 0x16f   : > { %1686 = vmatpush3.msra.mxu0 %v1299_v18 }
 0x170   : > { %1687 = vmatprep.subr.mxu0 %v1873_v1 }
 0x171   : > { %1688 = vmatpush3.msra.mxu0 %v1298_v19 }
 0x172   : > { %1689 = vmatprep.subr.mxu0 %v1873_v1 }
 0x1ae   : > { %v680_v28 = vpop.f32.mrf.mxu1 }
 0x1af   : > { %v685_v29 = vsel %vm684_vm2, %v680_v28, -inf }
 0x1b0   : > { %686 = vmax.xlane.f32.xlu0 %v685_v29  ;;  %v1645_v30 = vpop.f32.mrf.mxu1  ;;  %v1290_v29 = vld [vmem:[%s2263_s6 + $0x20] sm:$0xff] }
 0x1b1   : > { %v1289_v30 = vld [vmem:[%s2263_s6 + $0x18] sm:$0xff] }
 0x222   : > { %v844_v31 = vpop.f32.mrf.mxu0 }
 0x223   : > { %v848_v32 = vsel %vm684_vm2, %v844_v31, -inf }
 0x224   : > { %849 = vmax.xlane.f32.xlu1 %v848_v32  ;;  %v1655_v33 = vpop.f32.mrf.mxu0  ;;  %v1287_v32 = vld [vmem:[%s2263_s6 + $0x8] sm:$0xff] }
 0x225   : > { %v1286_v33 = vld [vmem:[%s2263_s6] sm:$0xff] }
 0x226   : > { %v1011_v34 = vpop.f32.mrf.mxu0 }
 0x227   : > { %v1015_v35 = vsel %vm684_vm2, %v1011_v34, -inf }
 0x228   : > { %v1665_v36 = vpop.f32.mrf.mxu0  ;;  %1016 = vmax.xlane.f32.xlu0 %v1015_v35 }
 0x22a   : > { %v1177_v37 = vpop.f32.mrf.mxu0 }
 0x22b   : > { %v1181_v38 = vsel %vm684_vm2, %v1177_v37, -inf }
 0x22c   : > { %v1675_v39 = vpop.f32.mrf.mxu0  ;;  %1182 = vmax.xlane.f32.xlu0 %v1181_v38 }
 0x235   : > { %861 = vrot.lane.b32.xlu1 %v2068_v20, %s2268_s23  ;;  %s1781_s23 = scalar_lea.vmem %s1415_s16, 128 }
 0x236   : > { %p1782_p11 = scmp.ne.s32.totalorder %s1415_s16, %s1781_s23 }
 0x238   : > { %p1783_p12 = pnand %p1782_p11, %p1968_p5 }
 0x239   : > { %v687_v40 = vpop.xlane.xlu0 %686 }
 0x23a   : > { %v688_v41 = vsub.f32 %v680_v28, %v687_v40  ;;  %v1291_v28 = vld [vmem:[%s2263_s6 + $0x28] sm:$0xff]  ;;  %p1784_p13 = pneg %p1783_p12 }
 0x23c   : > { %v689_v42 = vmul.f32 1.442695, %v688_v41 }
 0x23e   : > { %1765 = vpow2.f32 %v689_v42 }
 0x24b   : > { %v1766_v43 = vpop.eup %1765 }
 0x24c   : > { %v691_v44 = vsel %vm684_vm2, %v1766_v43, 0.0 }
 0x259   : > { %692 = vadd.xlane.f32.xlu1 %v691_v44 }
 0x2ad   : > { %v850_v45 = vpop.xlane.xlu1 %849 }
 0x2ae   : > { %v851_v46 = vsub.f32 %v844_v31, %v850_v45  ;;  %v1288_v31 = vld [vmem:[%s2263_s6 + $0x10] sm:$0xff] }
 0x2b0   : > { %v852_v47 = vmul.f32 1.442695, %v851_v46 }
 0x2b1   : > { %v1017_v48 = vpop.xlane.xlu0 %1016  ;;  %v862_v60 = vpop.permute.xlu1 %861 }
 0x2b2   : > { %1767 = vpow2.f32 %v852_v47  ;;  %v1018_v49 = vsub.f32 %v1011_v34, %v1017_v48 }
 0x2b4   : > { %v1019_v50 = vmul.f32 1.442695, %v1018_v49 }
 0x2b5   : > { %v1183_v51 = vpop.xlane.xlu0 %1182 }
 0x2b6   : > { %1769 = vpow2.f32 %v1019_v50  ;;  %v1184_v52 = vsub.f32 %v1177_v37, %v1183_v51 }
 0x2b8   : > { %v1185_v53 = vmul.f32 1.442695, %v1184_v52 }
 0x2ba   : > { %1771 = vpow2.f32 %v1185_v53 }
 0x2bf   : > { %v1768_v54 = vpop.eup %1767 }
 0x2c0   : > { %v854_v55 = vsel %vm684_vm2, %v1768_v54, 0.0 }
 0x2c1   : > { %855 = vadd.xlane.f32.xlu0 %v854_v55 }
 0x2c3   : > { %v1770_v56 = vpop.eup %1769 }
 0x2c4   : > { %v1021_v57 = vsel %vm684_vm2, %v1770_v56, 0.0 }
 0x2c5   : > { %1022 = vadd.xlane.f32.xlu1 %v1021_v57 }
 0x2c7   : > { %v1772_v58 = vpop.eup %1771 }
 0x2c8   : > { %v1187_v59 = vsel %vm684_vm2, %v1772_v58, 0.0 }
 0x2c9   : > { %1188 = vadd.xlane.f32.xlu0 %v1187_v59 }
 0x2d6   : > { %1193 = vrot.lane.b32.xlu1 %v2068_v20, %s1877_s28 }
 0x2df   : > { %1027 = vrot.lane.b32.xlu0 %v2068_v20, %s1875_s22  ;;  %v1297_v20 = vld [vmem:[%s2263_s6 + $0x58] sm:$0xff] }
 0x2e0   : > { %1690 = vmatpush3.msra.mxu0 %v1297_v20 }
 0x2e1   : > { %1691 = vmatprep.subr.mxu0 %v1873_v1 }
 0x2e2   : > { %v693_v61 = vpop.xlane.xlu1 %692  ;;  %1692 = vmatpush3.msra.mxu0 %v1296_v21 }
 0x2e3   : > { %1773 = vrcp.f32 %v693_v61  ;;  %1693 = vmatprep.subr.mxu0 %v1873_v1 }
 0x2e4   : > { %1694 = vmatpush3.msra.mxu0 %v1295_v22 }
 0x2e5   : > { %1695 = vmatprep.subr.mxu0 %v1873_v1 }
 0x2e6   : > { %1696 = vmatpush3.msra.mxu0 %v1294_v23 }
 0x2e7   : > { %1697 = vmatprep.subr.mxu0 %v1873_v1 }
 0x2e8   : > { %1698 = vmatpush3.msra.mxu0 %v1293_v25 }
 0x2e9   : > { %1699 = vmatprep.subr.mxu0 %v1873_v1 }
 0x2ea   : > { %1700 = vmatpush3.msra.mxu0 %v1292_v27 }
 0x2eb   : > { %1701 = vmatprep.subr.mxu0 %v1873_v1 }
 0x2ec   : > { %1702 = vmatpush3.msra.mxu0 %v1291_v28 }
 0x2ed   : > { %1703 = vmatprep.subr.mxu0 %v1873_v1 }
 0x2ee   : > { %1704 = vmatpush3.msra.mxu0 %v1290_v29 }
 0x2ef   : > { %1705 = vmatprep.subr.mxu0 %v1873_v1 }
 0x2f0   : > { %v1774_v62 = vpop.eup %1773  ;;  %1706 = vmatpush3.msra.mxu0 %v1289_v30 }
 0x2f1   : > { %v695_v63 = vmul.f32 %v1774_v62, %v1766_v43  ;;  %1707 = vmatprep.subr.mxu0 %v1873_v1 }
 0x2f2   : > { %1708 = vmatpush3.msra.mxu0 %v1288_v31 }
 0x2f3   : > { %1649 = vmatmul.mubr.msk.f32.vlgmr.msra.gmra.mxu1 %vm684_vm2, %v695_v63  ;;  %1709 = vmatprep.subr.mxu0 %v1873_v1 }
 0x2f4   : > { %1657 = vmatpush3.msra.mxu1 %v862_v60  ;;  %1658 = vmatprep.mubr.msk.f32.mxu1 %vm1874_vm0, %v1873_v1 }
 0x2f5   : > { %1666 = vmatprep.subr.mxu1 %v1873_v1  ;;  %1710 = vmatpush3.msra.mxu0 %v1287_v32 }
 0x2f6   : > { %1711 = vmatprep.subr.mxu0 %v1873_v1 }
 0x2f7   : > { %1712 = vmatpush3.msra.mxu0 %v1286_v33 }
 0x34a   : > { %v856_v0 = vpop.xlane.xlu0 %855 }
 0x34b   : > { %1775 = vrcp.f32 %v856_v0 }
 0x34e   : > { %v1023_v2 = vpop.xlane.xlu1 %1022 }
 0x34f   : > { %1777 = vrcp.f32 %v1023_v2 }
 0x352   : > { %v1189_v3 = vpop.xlane.xlu0 %1188  ;;  %v1194_v9 = vpop.permute.xlu1 %1193 }
 0x353   : > { %1779 = vrcp.f32 %v1189_v3 }
 0x356   : > { %v1028_v6 = vpop.permute.xlu0 %1027 }
 0x358   : > { %v1776_v4 = vpop.eup %1775 }
 0x359   : > { %v858_v5 = vmul.f32 %v1776_v4, %v1768_v54 }
 0x35b   : > { %1659 = vmatmul.mubr.msk.f32.vlgmr.msra.gmra.mxu1 %vm684_vm2, %v858_v5  ;;  %v859_v10 = vadd.f32 %v858_v5, %v695_v63 }
 0x35c   : > { %v1778_v7 = vpop.eup %1777  ;;  %1667 = vmatpush3.msra.mxu1 %v1028_v6  ;;  %1668 = vmatprep.mubr.msk.f32.mxu1 %vm1874_vm0, %v1873_v1 }
 0x35d   : > { %1676 = vmatprep.subr.mxu1 %v1873_v1  ;;  %v1025_v8 = vmul.f32 %v1778_v7, %v1770_v56 }
 0x35f   : > { %1669 = vmatmul.mubr.msk.f32.vlgmr.msra.gmra.mxu1 %vm684_vm2, %v1025_v8  ;;  %v1026_v13 = vadd.f32 %v1025_v8, %v859_v10 }
 0x360   : > { %v1780_v11 = vpop.eup %1779  ;;  %1677 = vmatpush3.msra.mxu1 %v1194_v9  ;;  %1678 = vmatprep.mubr.msk.f32.mxu1 %vm1874_vm0, %v1873_v1 }
 0x361   : > { %v1191_v12 = vmul.f32 %v1780_v11, %v1772_v58 }
 0x363   : > { %1679 = vmatmul.mubr.msk.f32.vlgmr.msra.gmra.mxu1 %vm684_vm2, %v1191_v12  ;;  %v1192_v14 = vadd.f32 %v1191_v12, %v1026_v13 }
 0x365   : > { %v1380_v15 = vmul.f32 0.25, %v1192_v14 }
 0x367   : > { %1381 = vst.msk [vmem:[%s2119_s26] sm:$0xff] %vm684_vm2, %v1380_v15 }
 0x3b3   : > { %v766_v24 = vpop.f32.mrf.mxu1 }
 0x3b5   : > { %v1650_v26 = vpop.f32.mrf.mxu1 }
 0x41b   : > { %v933_v34 = vpop.f32.mrf.mxu1 }
 0x41c   : > { %1270 = vrot.lane.b32.xlu1 %v933_v34, %s1877_s28  ;;  %s2269_s28 = sshll.u32 %s1951_s13, 7 }
 0x41d   : > { %v1660_v35 = vpop.f32.mrf.mxu1  ;;  %s1412_s14 = scalar_lea.hbm %s2266_s9, %s2269_s28 }
 0x41f   : > { %v1099_v36 = vpop.f32.mrf.mxu1 }
 0x420   : > { %1274 = vrot.lane.b32.xlu0 %v1099_v36, %s1875_s22 }
 0x421   : > { %v1670_v37 = vpop.f32.mrf.mxu1 }
 0x423   : > { %v1265_v38 = vpop.f32.mrf.mxu1 }
 0x424   : > { %1278 = vrot.lane.b32.xlu1 %v1265_v38, %s2276_s27  ;;  %s1787_s27 = scalar_lea.vmem %s1786_s21, 256 }
 0x425   : > { %v1680_v1 = vpop.f32.mrf.mxu1  ;;  %p1789_p1 = scmp.lt.s32.totalorder %s1787_s27, %s1781_s23 }
 0x427   : > { %p1790_p2 = por %p1789_p1, %p1788_p0 }
 0x429   : > { %p1791_p3 = pnand %p1790_p2, %p1784_p13 }
 0x48e   : > { %v1271_v39 = vpop.permute.xlu1 %1270 }
 0x48f   : > { %v1281_v41 = vsel %vm380_vm1, %v766_v24, %v1271_v39 }
 0x492   : > { %v1275_v40 = vpop.permute.xlu0 %1274 }
 0x493   : > { %v1283_v42 = vsel %vm1282_vm3, %v1281_v41, %v1275_v40 }
 0x496   : > { %v1279_v43 = vpop.permute.xlu1 %1278 }
 0x497   : > { %v1285_v44 = vsel %vm1284_vm4, %v1283_v42, %v1279_v43 }
 0x498   : > { %1714 = vmatmul.mubr.f32.vlgmr.msra.gmra.mxu0 %v1285_v44 }
 0x499   : > { %1794 = shalt.err (!%p1791_p3)
}
 0x49a   : > { %s1795_s0 = scalar_lea.hbm %s1412_s14, 128  ;;  %s1799_s29 = scalar_lea.hbm %s2266_s9, 256 }
 0x49b   : > { %p1796_p4 = scmp.ne.s32.totalorder %s1412_s14, %s1795_s0  ;;  %p1800_p9 = scmp.lt.s32.totalorder %s1412_s14, %s2266_s9 }
 0x49c   : > { %p1801_p10 = scmp.lt.s32.totalorder %s1799_s29, %s1795_s0 }
 0x49d   : > { %p1797_p7 = pnand %p1796_p4, %p1968_p5 }
 0x49e   : > { %p1802_p11 = por %p1801_p10, %p1800_p9 }
 0x49f   : > { %p1798_p8 = pneg %p1797_p7 }
 0x4a1   : > { %p1803_p12 = pnand %p1802_p11, %p1798_p8 }
 0x4a3   : > { %1806 = shalt.err (!%p1803_p12)
}
 0x4a4   : > { %1717 = dma.vmem_to_hbm [thread:$0]  (%p1968_p5), %s1415_s16, 128, %s1412_s14, %s1388_s17   ;;  %v1553_v45 = vld [vmem:[%s2264_s7] ss:$0 sm:$0xff] }
 0x4a5   : > { %s2277_s21 = sshll.u32 %s2110_s24, 3  ;;  %s2278_s0 = sshll.u32 %s1951_s13, 7 }
 0x4a6   : > { %s353_s27 = scalar_lea.vmem [#allocation2], %s2277_s21  ;;  %s2220_s22 = scalar_lea.hbm %s2265_s8, %s2278_s0 }
 0x4a7   : > { %s1401_s26 = sshll.u32 %s353_s27, 4  ;;  %s1383_s14 = scalar_lea.sflag [#allocation3], %s2110_s24  ;;  %s1402_s26 = int_to_ptr.vmem [resolvable:$true] %s1401_s26 }
 0x4a8   : > { %s1807_s16 = scalar_lea.vmem %s1402_s26, 128  ;;  %s1879_s17 = smov [#allocation2]  }
 0x4a9   : > { %p1808_p13 = scmp.ne.s32.totalorder %s1402_s26, %s1807_s16  ;;  %s1811_s29 = sshll.u32 %s1879_s17, 4  ;;  %s1812_s29 = int_to_ptr.vmem [resolvable:$false] %s1811_s29 }
 0x4aa   : > { %s1813_s23 = scalar_lea.vmem %s1812_s29, 256  ;;  %p1814_p2 = scmp.lt.s32.totalorder %s1402_s26, %s1812_s29 }
 0x4ab   : > { %p1809_p0 = pnand %p1808_p13, %p1968_p5  ;;  %p1815_p3 = scmp.lt.s32.totalorder %s1813_s23, %s1807_s16 }
 0x4ad   : > { %p1810_p1 = pneg %p1809_p0  ;;  %p1816_p4 = por %p1815_p3, %p1814_p2 }
 0x4af   : > { %p1817_p7 = pnand %p1816_p4, %p1810_p1 }
 0x558   : > { %v1375_v46 = vpop.f32.mrf.mxu0 }
 0x559   : > { %v1376_v47 = vadd.f32 %v1553_v45, %v1375_v46 }
 0x55a   : > { %v1715_v48 = vpop.f32.mrf.mxu0 }
 0x55b   : > { %1379 = vst.msk [vmem:[%s353_s27] sm:$0xff] %vm380_vm1, %v1376_v47 }
 0x55c   : > { %1820 = shalt.err (!%p1817_p7)
}
 0x55d   : > { %s1821_s13 = scalar_lea.hbm %s2220_s22, 128  ;;  %s1825_s21 = scalar_lea.hbm %s2265_s8, 256 }
 0x55e   : > { %p1822_p8 = scmp.ne.s32.totalorder %s2220_s22, %s1821_s13  ;;  %p1826_p11 = scmp.lt.s32.totalorder %s2220_s22, %s2265_s8 }
 0x55f   : > { %p1827_p12 = scmp.lt.s32.totalorder %s1825_s21, %s1821_s13 }
 0x560   : > { %p1823_p9 = pnand %p1822_p8, %p1968_p5 }
 0x561   : > { %p1828_p13 = por %p1827_p12, %p1826_p11 }
 0x562   : > { %p1824_p10 = pneg %p1823_p9 }
 0x564   : > { %p1829_p0 = pnand %p1828_p13, %p1824_p10 }
 0x566   : > { %1832 = shalt.err (!%p1829_p0)
}
 0x567   : > { %1716 = dma.vmem_to_hbm [thread:$0]  (%p1968_p5), %s1402_s26, 128, %s2220_s22, %s1383_s14  }
 0x568 PF: > { %p1727_p1 = scmp.ge.s32.totalorder %s1871_s12, 2  ;;  %s1426_s1 = sand.u32 1, %s1859_s30  }
 0x569   : > { %s1427_s28 = scalar_lea.sflag [#allocation3], %s1426_s1 }
 0x56a   : > { %p1721_p2 = pnand %p1727_p1, %p1972_p6 }
 0x56c   : > { %p1722_p3 = pneg %p1721_p2 }
 0x56e   : > { %1850 = dma.done.wait (%p1722_p3), %s1427_s28, 128  }
 0x56f   : > { %1852 = vsyncadd (%p1722_p3), %s1427_s28, 4294967168  ;;  %s1436_s16 = scalar_lea.sflag [#allocation5], %s1426_s1 }
 0x570   : > { %1854 = dma.done.wait (%p1722_p3), %s1436_s16, 128  }
 0x571   : > { %1856 = vsyncadd (%p1722_p3), %s1436_s16, 4294967168  ;;  %p23_p5 = scmp.ge.s32.totalorder %s1955_s15, 4   ;;  %s2279_s30 = smov %s1863_s10 }
 0x572   : > { %s2280_s10 = smov %s1867_s11  ;;  %s2281_s11 = smov %s1966_s18 }
 0x573   : > { %s2282_s12 = smov %s1955_s15  ;;  %25 = sbr.rel (!%p23_p5) target bundleno = 8 (0x8), region = 110 }
 0x578   :  { %1441 = vsyncpa [#allocation3], 1 }
 0x579   :  { %1443 = vsyncpa [#allocation3 + $0x1], 1 }
 0x57a   :  { %1444 = vsyncpa [#allocation5], 1 }
 0x57b   :  { %1446 = vsyncpa [#allocation5 + $0x1], 1 }

</bundles_post_ra>
